<compile_context>
chip_gen: v7x
topology: tpu7x:2x2x1
jax: 0.10.0
libtpu: 0.0.40
codegen_flags: <defaults>
</compile_context>

<pallas_src>
import jax
import jax.numpy as jnp
import numpy as np
from jax.experimental import pallas as pl
from jax.experimental.pallas import tpu as pltpu

# ---- model configuration (matches the PyTorch module at toy sizes) ----
B = 8               # example batch size
DD = 3              # number of dense features
NF = 4              # number of sparse fields (CIN input_dim)
E = 8               # embedding dim
FEAT_NUM = 10       # vocab size per sparse feature
L = 2               # CIN layer_num
HIDDEN = [32, 16]   # user hidden_units (input dim gets inserted in front)

NFE = NF * E        # 32: rows of the embedding / CIN-state block (f*E + e)
DDP = 8             # dense rows padded up to a sublane multiple
ACT_ROWS = NFE + DDP            # 40: merged activation rows (emb ++ dense)
H1, H2 = HIDDEN
HEAD_DIM = DDP + L * NFE + H2   # 8 + 64 + 16 = 88


def xdeepfm_kernel(act_ref,                      # [ACT_ROWS, BT] bf16 (emb ++ dense)
                   wk_ref, cb_ref,               # CIN  [L, NF*NFE, NFE] bf16, [L, NFE, 1] f32
                   w1_ref, b1_ref,               # DNN1 [H1, ACT_ROWS] bf16, [H1, 1] f32
                   w2_ref, b2_ref,               # DNN2 [H2, H1] bf16, [H2, 1] f32
                   hw_ref, hb_ref,               # head [HEAD_DIM, 1] f32, [1, 1] f32
                   out_ref):                     # out  [1, BT] f32
    f32 = jnp.float32
    bf16 = jnp.bfloat16

    act = act_ref[...]                           # [ACT_ROWS, BT] bf16 (MXU operand)
    act_f = act.astype(f32)                      # f32 copy for VPU math
    emb_bf = act[:NFE]                           # [NFE, BT] bf16
    emb = act_f[:NFE]                            # [NFE, BT] f32
    dense = act_f[NFE:]                          # [DDP, BT] f32 (rows DD..7 are zero pad)

    # Stacked x0 multiplier, built exactly once and reused by every CIN layer:
    # row [i*NFE + o*E + e] = emb[i*E + e]   (field-i block repeated NF times).
    x0_stack = jnp.concatenate(
        [emb[i * E:(i + 1) * E] for i in range(NF) for _ in range(NF)], axis=0)  # [NF*NFE, BT]

    # ----- CIN: h_{l+1}[o*E+e] = relu( sum_i x0[i*E+e] * sum_j W_l[o, i*NF+j] * h_l[j*E+e] + b_l[o] )
    # One stacked [128, 32] x [32, BT] bf16 matmul per layer (f32 accumulation).
    h_bf = emb_bf
    hs = []
    for l in range(L):
        s = jnp.dot(wk_ref[l], h_bf, preferred_element_type=f32)    # [NF*NFE, BT] f32
        t = x0_stack * s
        conv = t[0:NFE] + t[NFE:2 * NFE] + t[2 * NFE:3 * NFE] + t[3 * NFE:4 * NFE]
        h = jnp.maximum(conv + cb_ref[l], 0.0)                      # [NFE, BT] f32
        hs.append(h)
        h_bf = h.astype(bf16)

    # ----- DNN: layer 1 consumes the merged (emb ++ dense) activation in one dot.
    a = jnp.maximum(jnp.dot(w1_ref[...], act, preferred_element_type=f32)
                    + b1_ref[...], 0.0)                             # [H1, BT] f32
    a = jnp.maximum(jnp.dot(w2_ref[...], a.astype(bf16), preferred_element_type=f32)
                    + b2_ref[...], 0.0)                             # [H2, BT] f32

    # ----- Head on VPU/XLU (no concat, no M=1 MXU matmul):
    # logit = linear(dense) + cin_fc(sum_e cat(hs)) + final(a) + (all biases)
    hw = hw_ref[...]                                                # [HEAD_DIM, 1] f32
    logit = jnp.sum(hw[0:DDP] * dense, axis=0, keepdims=True) + hb_ref[...]
    off = DDP
    for l in range(L):
        logit = logit + jnp.sum(hw[off:off + NFE] * hs[l], axis=0, keepdims=True)
        off += NFE
    logit = logit + jnp.sum(hw[off:off + H2] * a, axis=0, keepdims=True)
    out_ref[...] = jax.nn.sigmoid(logit)                            # [1, BT]


def init_params(key):
    keys = jax.random.split(key, 20)
    p = {}
    p['embed'] = [0.1 * jax.random.normal(keys[i], (FEAT_NUM, E), jnp.float32)
                  for i in range(NF)]
    p['lin_w'] = 0.1 * jax.random.normal(keys[4], (1, DD), jnp.float32)
    p['lin_b'] = 0.1 * jax.random.normal(keys[5], (1,), jnp.float32)
    p['conv_w'] = [0.1 * jax.random.normal(keys[6 + i], (NF, NF * NF), jnp.float32)
                   for i in range(L)]
    p['conv_b'] = [0.1 * jax.random.normal(keys[8 + i], (NF,), jnp.float32)
                   for i in range(L)]
    p['cin_fc_w'] = 0.1 * jax.random.normal(keys[10], (1, NF * L), jnp.float32)
    p['cin_fc_b'] = 0.1 * jax.random.normal(keys[11], (1,), jnp.float32)
    p['dnn_w1'] = 0.1 * jax.random.normal(keys[12], (H1, NF * E + DD), jnp.float32)
    p['dnn_b1'] = 0.1 * jax.random.normal(keys[13], (H1,), jnp.float32)
    p['dnn_w2'] = 0.1 * jax.random.normal(keys[14], (H2, H1), jnp.float32)
    p['dnn_b2'] = 0.1 * jax.random.normal(keys[15], (H2,), jnp.float32)
    p['final_w'] = 0.1 * jax.random.normal(keys[16], (1, H2), jnp.float32)
    p['final_b'] = 0.1 * jax.random.normal(keys[17], (1,), jnp.float32)
    return p


def _round_up(x, m):
    return ((x + m - 1) // m) * m


@jax.jit
def xdeepfm_forward(dense, sparse_ids, params):
    """dense: [B, DD] float32; sparse_ids: [B, NF] int32 (the module's x[:, DD:].long())."""
    bn = dense.shape[0]
    # Adaptive lane tile: big tiles amortise per-grid-step overhead; the 512 cap keeps
    # >= 2 grid steps (megacore / pipelining) once the batch grows past one tile.
    b_tile = min(512, _round_up(bn, 128))
    b_pad = _round_up(bn, b_tile)
    n_tiles = b_pad // b_tile

    # --- batch padding + feature-major embedding gather ---
    # Transpose the tiny [FEAT_NUM, E] tables, never the [Bp, NFE] activation.
    dense_p = jnp.pad(dense.astype(jnp.float32), ((0, b_pad - bn), (0, 0)))    # [Bp, DD]
    ids_p = jnp.pad(sparse_ids.astype(jnp.int32), ((0, b_pad - bn), (0, 0)))   # [Bp, NF]
    emb_fm = jnp.concatenate(
        [params['embed'][i].T[:, ids_p[:, i]] for i in range(NF)], axis=0)     # [NFE, Bp]
    dense_fm = jnp.pad(dense_p.T, ((0, DDP - DD), (0, 0)))                     # [DDP, Bp]
    act_fm = jnp.concatenate([emb_fm, dense_fm], axis=0).astype(jnp.bfloat16)  # [ACT_ROWS, Bp]

    # --- weight prep (tiny; traced under jit) ---
    eye_e = jnp.eye(E, dtype=jnp.float32)
    # Stacked Kronecker CIN weights: wk[l] = vstack_i kron(W_l[:, i*NF:(i+1)*NF], I_E).
    wk = jnp.stack([
        jnp.concatenate(
            [jnp.kron(params['conv_w'][l][:, i * NF:(i + 1) * NF], eye_e)
             for i in range(NF)], axis=0)
        for l in range(L)]).astype(jnp.bfloat16)                               # [L, NF*NFE, NFE]
    cb = jnp.stack([jnp.repeat(params['conv_b'][l], E)[:, None]
                    for l in range(L)])                                        # [L, NFE, 1]
    w1 = jnp.pad(params['dnn_w1'], ((0, 0), (0, DDP - DD))).astype(jnp.bfloat16)  # [H1, ACT_ROWS]
    b1 = params['dnn_b1'][:, None]                                             # [H1, 1]
    w2 = params['dnn_w2'].astype(jnp.bfloat16)                                 # [H2, H1]
    b2 = params['dnn_b2'][:, None]                                             # [H2, 1]
    # Head column vector: [linear(dense, padded) | cin_fc repeated over embed | final].
    hw = jnp.concatenate([
        jnp.pad(params['lin_w'][0], (0, DDP - DD)),
        jnp.repeat(params['cin_fc_w'][0], E),          # absorbs the embed sum-pool
        params['final_w'][0],
    ])[:, None].astype(jnp.float32)                                            # [HEAD_DIM, 1]
    hb = (params['lin_b'] + params['cin_fc_b'] + params['final_b']).reshape(1, 1)

    args = (act_fm, wk, cb, w1, b1, w2, b2, hw, hb)

    def full_spec(a):
        nd = a.ndim
        return pl.BlockSpec(a.shape, lambda t, nd=nd: (0,) * nd)

    in_specs = [pl.BlockSpec((ACT_ROWS, b_tile), lambda t: (0, t))] \
        + [full_spec(a) for a in args[1:]]

    flops = 2 * b_pad * (L * (NF * NFE) * NFE + H1 * ACT_ROWS + H2 * H1 + HEAD_DIM)
    bytes_accessed = int(act_fm.size) * 2 + b_pad * 4 + sum(
        int(np.prod(a.shape)) * a.dtype.itemsize for a in args[1:])

    out = pl.pallas_call(
        xdeepfm_kernel,
        out_shape=jax.ShapeDtypeStruct((1, b_pad), jnp.float32),
        grid=(n_tiles,),
        in_specs=in_specs,
        out_specs=pl.BlockSpec((1, b_tile), lambda t: (0, t)),
        compiler_params=pltpu.CompilerParams(
            dimension_semantics=("parallel",)),
        cost_estimate=pl.CostEstimate(
            flops=int(flops), transcendentals=int(2 * b_pad),
            bytes_accessed=int(bytes_accessed)),
    )(*args)
    return out[0, :bn]


def reference_forward(dense, sparse_ids, params):
    """Pure-JAX mirror of the PyTorch module (batch-major, PyTorch conventions, f32)."""
    bn = dense.shape[0]
    embeds = [params['embed'][i][sparse_ids[:, i]] for i in range(NF)]
    cin_input = jnp.stack(embeds, axis=1)                                  # [B, NF, E]
    dnn_x = jnp.concatenate([jnp.concatenate(embeds, axis=-1), dense], axis=-1)

    linear_out = dense @ params['lin_w'].T + params['lin_b']               # [B, 1]

    x0 = cin_input[:, :, None, :]
    h = cin_input
    xs = []
    for l in range(L):
        z = (x0 * h[:, None, :, :]).reshape(bn, -1, E)                     # [B, NF*NF, E]
        conv = jnp.einsum('oc,bce->boe', params['conv_w'][l], z) \
            + params['conv_b'][l][None, :, None]
        h = jax.nn.relu(conv)
        xs.append(h)
    pooled = jnp.sum(jnp.concatenate(xs, axis=1), axis=2)                  # [B, NF*L]
    cin_out = pooled @ params['cin_fc_w'].T + params['cin_fc_b']           # [B, 1]

    a = jax.nn.relu(dnn_x @ params['dnn_w1'].T + params['dnn_b1'])
    a = jax.nn.relu(a @ params['dnn_w2'].T + params['dnn_b2'])
    deep_out = a @ params['final_w'].T + params['final_b']                 # [B, 1]

    return jax.nn.sigmoid(linear_out + cin_out + deep_out).reshape(bn)


if __name__ == "__main__":
    key = jax.random.PRNGKey(0)
    pk, dk, sk = jax.random.split(key, 3)
    params = init_params(pk)

    dense = jax.random.uniform(dk, (B, DD), jnp.float32)
    sparse_ids = jax.random.randint(sk, (B, NF), 0, FEAT_NUM)              # int32 ids

    out = jax.block_until_ready(xdeepfm_forward(dense, sparse_ids, params))
    ref = jax.block_until_ready(reference_forward(dense, sparse_ids, params))
    # bf16 MXU operands (f32 accumulation) -> compare against the f32 reference with
    # a tolerance that covers bf16 operand rounding.
    np.testing.assert_allclose(np.asarray(out), np.asarray(ref), rtol=2e-2, atol=2e-2)
    print("KERNEL_OK")
</pallas_src>

<mosaic_0001>
module attributes {stable_mosaic.version = 11 : i64} {
  func.func @xdeepfm_kernel(%arg0: i32, %arg1: memref<40x128xbf16, #tpu.memory_space<vmem>>, %arg2: memref<2x128x32xbf16, #tpu.memory_space<vmem>>, %arg3: memref<2x32x1xf32, #tpu.memory_space<vmem>>, %arg4: memref<32x40xbf16, #tpu.memory_space<vmem>>, %arg5: memref<32x1xf32, #tpu.memory_space<vmem>>, %arg6: memref<16x32xbf16, #tpu.memory_space<vmem>>, %arg7: memref<16x1xf32, #tpu.memory_space<vmem>>, %arg8: memref<88x1xf32, #tpu.memory_space<vmem>>, %arg9: memref<1x1xf32, #tpu.memory_space<vmem>>, %arg10: memref<1x128xf32, #tpu.memory_space<vmem>>) attributes {dimension_semantics = [#tpu.dimension_semantics<parallel>], iteration_bounds = array<i64: 1>, scalar_prefetch = 0 : i64, scratch_operands = 0 : i64, tpu.core_type = #tpu.core_type<tc>, window_params = [{transform_indices = @transform_0, window_bounds = array<i64: 40, 128>}, {pipeline_mode = #tpu.pipeline_mode<synchronous>, transform_indices = @transform_1, window_bounds = array<i64: 2, 128, 32>}, {pipeline_mode = #tpu.pipeline_mode<synchronous>, transform_indices = @transform_2, window_bounds = array<i64: 2, 32, 1>}, {pipeline_mode = #tpu.pipeline_mode<synchronous>, transform_indices = @transform_3, window_bounds = array<i64: 32, 40>}, {pipeline_mode = #tpu.pipeline_mode<synchronous>, transform_indices = @transform_4, window_bounds = array<i64: 32, 1>}, {pipeline_mode = #tpu.pipeline_mode<synchronous>, transform_indices = @transform_5, window_bounds = array<i64: 16, 32>}, {pipeline_mode = #tpu.pipeline_mode<synchronous>, transform_indices = @transform_6, window_bounds = array<i64: 16, 1>}, {pipeline_mode = #tpu.pipeline_mode<synchronous>, transform_indices = @transform_7, window_bounds = array<i64: 88, 1>}, {pipeline_mode = #tpu.pipeline_mode<synchronous>, transform_indices = @transform_8, window_bounds = array<i64: 1, 1>}, {transform_indices = @transform_9, window_bounds = array<i64: 1, 128>}]} {
    %c0 = arith.constant 0 : index
    %c0_0 = arith.constant 0 : index
    %0 = vector.load %arg1[%c0, %c0_0] : memref<40x128xbf16, #tpu.memory_space<vmem>>, vector<40x128xbf16>
    %1 = arith.extf %0 : vector<40x128xbf16> to vector<40x128xf32>
    %2 = vector.extract_strided_slice %0 {offsets = [0, 0], sizes = [32, 128], strides = [1, 1]} : vector<40x128xbf16> to vector<32x128xbf16>
    %3 = vector.extract_strided_slice %1 {offsets = [0, 0], sizes = [32, 128], strides = [1, 1]} : vector<40x128xf32> to vector<32x128xf32>
    %4 = vector.extract_strided_slice %1 {offsets = [32, 0], sizes = [8, 128], strides = [1, 1]} : vector<40x128xf32> to vector<8x128xf32>
    %5 = vector.extract_strided_slice %3 {offsets = [0, 0], sizes = [8, 128], strides = [1, 1]} : vector<32x128xf32> to vector<8x128xf32>
    %6 = vector.extract_strided_slice %3 {offsets = [0, 0], sizes = [8, 128], strides = [1, 1]} : vector<32x128xf32> to vector<8x128xf32>
    %7 = vector.extract_strided_slice %3 {offsets = [0, 0], sizes = [8, 128], strides = [1, 1]} : vector<32x128xf32> to vector<8x128xf32>
    %8 = vector.extract_strided_slice %3 {offsets = [0, 0], sizes = [8, 128], strides = [1, 1]} : vector<32x128xf32> to vector<8x128xf32>
    %9 = vector.extract_strided_slice %3 {offsets = [8, 0], sizes = [8, 128], strides = [1, 1]} : vector<32x128xf32> to vector<8x128xf32>
    %10 = vector.extract_strided_slice %3 {offsets = [8, 0], sizes = [8, 128], strides = [1, 1]} : vector<32x128xf32> to vector<8x128xf32>
    %11 = vector.extract_strided_slice %3 {offsets = [8, 0], sizes = [8, 128], strides = [1, 1]} : vector<32x128xf32> to vector<8x128xf32>
    %12 = vector.extract_strided_slice %3 {offsets = [8, 0], sizes = [8, 128], strides = [1, 1]} : vector<32x128xf32> to vector<8x128xf32>
    %13 = vector.extract_strided_slice %3 {offsets = [16, 0], sizes = [8, 128], strides = [1, 1]} : vector<32x128xf32> to vector<8x128xf32>
    %14 = vector.extract_strided_slice %3 {offsets = [16, 0], sizes = [8, 128], strides = [1, 1]} : vector<32x128xf32> to vector<8x128xf32>
    %15 = vector.extract_strided_slice %3 {offsets = [16, 0], sizes = [8, 128], strides = [1, 1]} : vector<32x128xf32> to vector<8x128xf32>
    %16 = vector.extract_strided_slice %3 {offsets = [16, 0], sizes = [8, 128], strides = [1, 1]} : vector<32x128xf32> to vector<8x128xf32>
    %17 = vector.extract_strided_slice %3 {offsets = [24, 0], sizes = [8, 128], strides = [1, 1]} : vector<32x128xf32> to vector<8x128xf32>
    %18 = vector.extract_strided_slice %3 {offsets = [24, 0], sizes = [8, 128], strides = [1, 1]} : vector<32x128xf32> to vector<8x128xf32>
    %19 = vector.extract_strided_slice %3 {offsets = [24, 0], sizes = [8, 128], strides = [1, 1]} : vector<32x128xf32> to vector<8x128xf32>
    %20 = vector.extract_strided_slice %3 {offsets = [24, 0], sizes = [8, 128], strides = [1, 1]} : vector<32x128xf32> to vector<8x128xf32>
    %21 = tpu.concatenate %5, %6, %7, %8, %9, %10, %11, %12, %13, %14, %15, %16, %17, %18, %19, %20 in 0 : vector<8x128xf32>, vector<8x128xf32>, vector<8x128xf32>, vector<8x128xf32>, vector<8x128xf32>, vector<8x128xf32>, vector<8x128xf32>, vector<8x128xf32>, vector<8x128xf32>, vector<8x128xf32>, vector<8x128xf32>, vector<8x128xf32>, vector<8x128xf32>, vector<8x128xf32>, vector<8x128xf32>, vector<8x128xf32> -> vector<128x128xf32>
    %c0_1 = arith.constant 0 : index
    %c0_2 = arith.constant 0 : index
    %c0_3 = arith.constant 0 : index
    %22 = vector.load %arg2[%c0_1, %c0_2, %c0_3] : memref<2x128x32xbf16, #tpu.memory_space<vmem>>, vector<1x128x32xbf16>
    %23 = vector.shape_cast %22 : vector<1x128x32xbf16> to vector<128x32xbf16>
    %cst = arith.constant dense<0.000000e+00> : vector<128x128xf32>
    %24 = tpu.matmul %23, %2, %cst {dimension_numbers = #tpu.dot_dimension_numbers<[1], [0], [0], [1], [0, 0, 1, 1], [], []>} : vector<128x32xbf16>, vector<32x128xbf16>, vector<128x128xf32> -> vector<128x128xf32>
    %25 = arith.mulf %21, %24 : vector<128x128xf32>
    %26 = vector.extract_strided_slice %25 {offsets = [0, 0], sizes = [32, 128], strides = [1, 1]} : vector<128x128xf32> to vector<32x128xf32>
    %27 = vector.extract_strided_slice %25 {offsets = [32, 0], sizes = [32, 128], strides = [1, 1]} : vector<128x128xf32> to vector<32x128xf32>
    %28 = arith.addf %26, %27 : vector<32x128xf32>
    %29 = vector.extract_strided_slice %25 {offsets = [64, 0], sizes = [32, 128], strides = [1, 1]} : vector<128x128xf32> to vector<32x128xf32>
    %30 = arith.addf %28, %29 : vector<32x128xf32>
    %31 = vector.extract_strided_slice %25 {offsets = [96, 0], sizes = [32, 128], strides = [1, 1]} : vector<128x128xf32> to vector<32x128xf32>
    %32 = arith.addf %30, %31 : vector<32x128xf32>
    %c0_4 = arith.constant 0 : index
    %c0_5 = arith.constant 0 : index
    %c0_6 = arith.constant 0 : index
    %33 = vector.load %arg3[%c0_4, %c0_5, %c0_6] : memref<2x32x1xf32, #tpu.memory_space<vmem>>, vector<1x32x1xf32>
    %34 = vector.shape_cast %33 : vector<1x32x1xf32> to vector<32x1xf32>
    %35 = vector.broadcast %34 : vector<32x1xf32> to vector<32x128xf32>
    %36 = arith.addf %32, %35 : vector<32x128xf32>
    %cst_7 = arith.constant 0.000000e+00 : f32
    %37 = vector.broadcast %cst_7 : f32 to vector<32x128xf32>
    %38 = arith.maximumf %36, %37 : vector<32x128xf32>
    %39 = arith.truncf %38 : vector<32x128xf32> to vector<32x128xbf16>
    %c1 = arith.constant 1 : index
    %c0_8 = arith.constant 0 : index
    %c0_9 = arith.constant 0 : index
    %40 = vector.load %arg2[%c1, %c0_8, %c0_9] : memref<2x128x32xbf16, #tpu.memory_space<vmem>>, vector<1x128x32xbf16>
    %41 = vector.shape_cast %40 : vector<1x128x32xbf16> to vector<128x32xbf16>
    %cst_10 = arith.constant dense<0.000000e+00> : vector<128x128xf32>
    %42 = tpu.matmul %41, %39, %cst_10 {dimension_numbers = #tpu.dot_dimension_numbers<[1], [0], [0], [1], [0, 0, 1, 1], [], []>} : vector<128x32xbf16>, vector<32x128xbf16>, vector<128x128xf32> -> vector<128x128xf32>
    %43 = arith.mulf %21, %42 : vector<128x128xf32>
    %44 = vector.extract_strided_slice %43 {offsets = [0, 0], sizes = [32, 128], strides = [1, 1]} : vector<128x128xf32> to vector<32x128xf32>
    %45 = vector.extract_strided_slice %43 {offsets = [32, 0], sizes = [32, 128], strides = [1, 1]} : vector<128x128xf32> to vector<32x128xf32>
    %46 = arith.addf %44, %45 : vector<32x128xf32>
    %47 = vector.extract_strided_slice %43 {offsets = [64, 0], sizes = [32, 128], strides = [1, 1]} : vector<128x128xf32> to vector<32x128xf32>
    %48 = arith.addf %46, %47 : vector<32x128xf32>
    %49 = vector.extract_strided_slice %43 {offsets = [96, 0], sizes = [32, 128], strides = [1, 1]} : vector<128x128xf32> to vector<32x128xf32>
    %50 = arith.addf %48, %49 : vector<32x128xf32>
    %c1_11 = arith.constant 1 : index
    %c0_12 = arith.constant 0 : index
    %c0_13 = arith.constant 0 : index
    %51 = vector.load %arg3[%c1_11, %c0_12, %c0_13] : memref<2x32x1xf32, #tpu.memory_space<vmem>>, vector<1x32x1xf32>
    %52 = vector.shape_cast %51 : vector<1x32x1xf32> to vector<32x1xf32>
    %53 = vector.broadcast %52 : vector<32x1xf32> to vector<32x128xf32>
    %54 = arith.addf %50, %53 : vector<32x128xf32>
    %cst_14 = arith.constant 0.000000e+00 : f32
    %55 = vector.broadcast %cst_14 : f32 to vector<32x128xf32>
    %56 = arith.maximumf %54, %55 : vector<32x128xf32>
    %c0_15 = arith.constant 0 : index
    %c0_16 = arith.constant 0 : index
    %57 = vector.load %arg4[%c0_15, %c0_16] : memref<32x40xbf16, #tpu.memory_space<vmem>>, vector<32x40xbf16>
    %cst_17 = arith.constant dense<0.000000e+00> : vector<32x128xf32>
    %58 = tpu.matmul %57, %0, %cst_17 {dimension_numbers = #tpu.dot_dimension_numbers<[1], [0], [0], [1], [0, 0, 1, 1], [], []>} : vector<32x40xbf16>, vector<40x128xbf16>, vector<32x128xf32> -> vector<32x128xf32>
    %c0_18 = arith.constant 0 : index
    %c0_19 = arith.constant 0 : index
    %59 = vector.load %arg5[%c0_18, %c0_19] : memref<32x1xf32, #tpu.memory_space<vmem>>, vector<32x1xf32>
    %60 = vector.broadcast %59 : vector<32x1xf32> to vector<32x128xf32>
    %61 = arith.addf %58, %60 : vector<32x128xf32>
    %cst_20 = arith.constant 0.000000e+00 : f32
    %62 = vector.broadcast %cst_20 : f32 to vector<32x128xf32>
    %63 = arith.maximumf %61, %62 : vector<32x128xf32>
    %c0_21 = arith.constant 0 : index
    %c0_22 = arith.constant 0 : index
    %64 = vector.load %arg6[%c0_21, %c0_22] : memref<16x32xbf16, #tpu.memory_space<vmem>>, vector<16x32xbf16>
    %65 = arith.truncf %63 : vector<32x128xf32> to vector<32x128xbf16>
    %cst_23 = arith.constant dense<0.000000e+00> : vector<16x128xf32>
    %66 = tpu.matmul %64, %65, %cst_23 {dimension_numbers = #tpu.dot_dimension_numbers<[1], [0], [0], [1], [0, 0, 1, 1], [], []>} : vector<16x32xbf16>, vector<32x128xbf16>, vector<16x128xf32> -> vector<16x128xf32>
    %c0_24 = arith.constant 0 : index
    %c0_25 = arith.constant 0 : index
    %67 = vector.load %arg7[%c0_24, %c0_25] : memref<16x1xf32, #tpu.memory_space<vmem>>, vector<16x1xf32>
    %68 = vector.broadcast %67 : vector<16x1xf32> to vector<16x128xf32>
    %69 = arith.addf %66, %68 : vector<16x128xf32>
    %cst_26 = arith.constant 0.000000e+00 : f32
    %70 = vector.broadcast %cst_26 : f32 to vector<16x128xf32>
    %71 = arith.maximumf %69, %70 : vector<16x128xf32>
    %c0_27 = arith.constant 0 : index
    %c0_28 = arith.constant 0 : index
    %72 = vector.load %arg8[%c0_27, %c0_28] : memref<88x1xf32, #tpu.memory_space<vmem>>, vector<88x1xf32>
    %73 = vector.extract_strided_slice %72 {offsets = [0, 0], sizes = [8, 1], strides = [1, 1]} : vector<88x1xf32> to vector<8x1xf32>
    %74 = vector.broadcast %73 : vector<8x1xf32> to vector<8x128xf32>
    %75 = arith.mulf %74, %4 : vector<8x128xf32>
    %cst_29 = arith.constant dense<0.000000e+00> : vector<128xf32>
    %76 = vector.multi_reduction <add>, %75, %cst_29 [0] : vector<8x128xf32> to vector<128xf32>
    %77 = vector.shape_cast %76 : vector<128xf32> to vector<1x128xf32>
    %c0_30 = arith.constant 0 : index
    %c0_31 = arith.constant 0 : index
    %78 = vector.load %arg9[%c0_30, %c0_31] : memref<1x1xf32, #tpu.memory_space<vmem>>, vector<1x1xf32>
    %79 = vector.broadcast %78 : vector<1x1xf32> to vector<1x128xf32>
    %80 = arith.addf %77, %79 : vector<1x128xf32>
    %81 = vector.extract_strided_slice %72 {offsets = [8, 0], sizes = [32, 1], strides = [1, 1]} : vector<88x1xf32> to vector<32x1xf32>
    %82 = vector.broadcast %81 : vector<32x1xf32> to vector<32x128xf32>
    %83 = arith.mulf %82, %38 : vector<32x128xf32>
    %cst_32 = arith.constant dense<0.000000e+00> : vector<128xf32>
    %84 = vector.multi_reduction <add>, %83, %cst_32 [0] : vector<32x128xf32> to vector<128xf32>
    %85 = vector.shape_cast %84 : vector<128xf32> to vector<1x128xf32>
    %86 = arith.addf %80, %85 : vector<1x128xf32>
    %87 = vector.extract_strided_slice %72 {offsets = [40, 0], sizes = [32, 1], strides = [1, 1]} : vector<88x1xf32> to vector<32x1xf32>
    %88 = vector.broadcast %87 : vector<32x1xf32> to vector<32x128xf32>
    %89 = arith.mulf %88, %56 : vector<32x128xf32>
    %cst_33 = arith.constant dense<0.000000e+00> : vector<128xf32>
    %90 = vector.multi_reduction <add>, %89, %cst_33 [0] : vector<32x128xf32> to vector<128xf32>
    %91 = vector.shape_cast %90 : vector<128xf32> to vector<1x128xf32>
    %92 = arith.addf %86, %91 : vector<1x128xf32>
    %93 = vector.extract_strided_slice %72 {offsets = [72, 0], sizes = [16, 1], strides = [1, 1]} : vector<88x1xf32> to vector<16x1xf32>
    %94 = vector.broadcast %93 : vector<16x1xf32> to vector<16x128xf32>
    %95 = arith.mulf %94, %71 : vector<16x128xf32>
    %cst_34 = arith.constant dense<0.000000e+00> : vector<128xf32>
    %96 = vector.multi_reduction <add>, %95, %cst_34 [0] : vector<16x128xf32> to vector<128xf32>
    %97 = vector.shape_cast %96 : vector<128xf32> to vector<1x128xf32>
    %98 = arith.addf %92, %97 : vector<1x128xf32>
    %99 = arith.negf %98 : vector<1x128xf32>
    %100 = math.exp %99 : vector<1x128xf32>
    %cst_35 = arith.constant 1.000000e+00 : f32
    %101 = vector.broadcast %cst_35 : f32 to vector<1x128xf32>
    %102 = arith.addf %101, %100 : vector<1x128xf32>
    %103 = arith.divf %101, %102 : vector<1x128xf32>
    %c0_36 = arith.constant 0 : index
    %c0_37 = arith.constant 0 : index
    %104 = vector.load %arg10[%c0_36, %c0_37] : memref<1x128xf32, #tpu.memory_space<vmem>>, vector<1x128xf32>
    tpu.vector_store %arg10[%c0_36, %c0_37], %103 {strides = array<i32>} : memref<1x128xf32, #tpu.memory_space<vmem>>, vector<1x128xf32>,
    return
  }
  func.func @transform_0(%arg0: i32) -> (i32, i32) {
    %c0_i32 = arith.constant 0 : i32
    %c0_i32_0 = arith.constant 0 : i32
    return %c0_i32, %arg0 : i32, i32
  }
  func.func @transform_1(%arg0: i32) -> (i32, i32, i32) {
    %c0_i32 = arith.constant 0 : i32
    %c0_i32_0 = arith.constant 0 : i32
    %c0_i32_1 = arith.constant 0 : i32
    %c0_i32_2 = arith.constant 0 : i32
    return %c0_i32, %c0_i32_0, %c0_i32_1 : i32, i32, i32
  }
  func.func @transform_2(%arg0: i32) -> (i32, i32, i32) {
    %c0_i32 = arith.constant 0 : i32
    %c0_i32_0 = arith.constant 0 : i32
    %c0_i32_1 = arith.constant 0 : i32
    %c0_i32_2 = arith.constant 0 : i32
    return %c0_i32, %c0_i32_0, %c0_i32_1 : i32, i32, i32
  }
  func.func @transform_3(%arg0: i32) -> (i32, i32) {
    %c0_i32 = arith.constant 0 : i32
    %c0_i32_0 = arith.constant 0 : i32
    %c0_i32_1 = arith.constant 0 : i32
    return %c0_i32, %c0_i32_0 : i32, i32
  }
  func.func @transform_4(%arg0: i32) -> (i32, i32) {
    %c0_i32 = arith.constant 0 : i32
    %c0_i32_0 = arith.constant 0 : i32
    %c0_i32_1 = arith.constant 0 : i32
    return %c0_i32, %c0_i32_0 : i32, i32
  }
  func.func @transform_5(%arg0: i32) -> (i32, i32) {
    %c0_i32 = arith.constant 0 : i32
    %c0_i32_0 = arith.constant 0 : i32
    %c0_i32_1 = arith.constant 0 : i32
    return %c0_i32, %c0_i32_0 : i32, i32
  }
  func.func @transform_6(%arg0: i32) -> (i32, i32) {
    %c0_i32 = arith.constant 0 : i32
    %c0_i32_0 = arith.constant 0 : i32
    %c0_i32_1 = arith.constant 0 : i32
    return %c0_i32, %c0_i32_0 : i32, i32
  }
  func.func @transform_7(%arg0: i32) -> (i32, i32) {
    %c0_i32 = arith.constant 0 : i32
    %c0_i32_0 = arith.constant 0 : i32
    %c0_i32_1 = arith.constant 0 : i32
    return %c0_i32, %c0_i32_0 : i32, i32
  }
  func.func @transform_8(%arg0: i32) -> (i32, i32) {
    %c0_i32 = arith.constant 0 : i32
    %c0_i32_0 = arith.constant 0 : i32
    %c0_i32_1 = arith.constant 0 : i32
    return %c0_i32, %c0_i32_0 : i32, i32
  }
  func.func @transform_9(%arg0: i32) -> (i32, i32) {
    %c0_i32 = arith.constant 0 : i32
    %c0_i32_0 = arith.constant 0 : i32
    return %c0_i32, %arg0 : i32, i32
  }
}

</mosaic_0001>

<bundles_post_ra>
// kernel: xdeepfm_forward.1
= control target key start
LH: loop header
LB: loop body
LE: loop exit
PB: predicated region body
PF: predicated region fallthrough
CT: control target
= control target key end

     0   :  { %vm113_vm0 = vcmask 261120   ;;  %v1023_v2 = vmov 0   ;;  %vm584_vm1 = vcmask 1043456   ;;  %vm577_vm2 = vcmask 326656   ;;  %s1337_s0 = inlined_call_operand.vmem [shape: bf16[40,128], index: 0, kind: input, shape index: {}]   ;;  %s1338_s1 = inlined_call_operand.vmem [shape: bf16[2,128,32], index: 1, kind: input, shape index: {}]   ;;  %s1339_s8 = inlined_call_operand.<no memory space> [shape: f32[1,1], index: 8, kind: input, shape index: {}]   ;;  %s1340_s3 = inlined_call_operand.vmem [shape: bf16[32,40], index: 3, kind: input, shape index: {}]   ;;  %s1341_s2 = inlined_call_operand.vmem [shape: f32[2,32,1], index: 2, kind: input, shape index: {}]   ;;  %s1342_s4 = inlined_call_operand.vmem [shape: f32[32,1], index: 4, kind: input, shape index: {}]   ;;  %s1343_s7 = inlined_call_operand.vmem [shape: f32[88,1], index: 7, kind: input, shape index: {}]   ;;  %s1344_s6 = inlined_call_operand.vmem [shape: f32[16,1], index: 6, kind: input, shape index: {}]   ;;  %s1345_s5 = inlined_call_operand.vmem [shape: bf16[16,32], index: 5, kind: input, shape index: {}]   ;;  %s1346_s9 = inlined_call_operand.vmem [shape: f32[1,128], index: 9, kind: output, shape index: {}]  }
   0x1   :  { %v1079_v0 = vld [vmem:[%s1337_s0] sm:$0xff]   ;;  %v1084_v1 = vld [vmem:[%s1337_s0 + $0x8] sm:$0xff]   ;;  %993 = vset.pattern.permute.xlu0 %v1023_v2  ;;  %994 = vset.pattern.permute.xlu1 %v1023_v2  ;;  %v14_v3 = vstv %s1339_s8  ;;  %v999_v6 = vld [vmem:[%s1338_s1 + $0x10] sm:$0xff]   ;;  %vm1025_vm3 = vmmov 0  }
   0x2   :  { %v997_v4 = vld [vmem:[%s1338_s1] sm:$0xff]   ;;  %15 = vst [vmem:[#allocation2] sm:$0x1] %v14_v3  ;;  %931 = vmatprep.subr.bf16.mxu0 %v1079_v0  ;;  %v998_v5 = vld [vmem:[%s1338_s1 + $0x8] sm:$0xff]   ;;  %v1107_v7 = vld [vmem:[%s1337_s0 + $0x10] sm:$0xf]  ;;  %v1234_v53 = vunpack.c.l.bf16 %v1079_v0  ;;  %v1237_v54 = vunpack.c.h.bf16 %v1079_v0 }
   0x3   :  { %935 = vmatprep.mubr.msk.bf16.mxu0 %vm113_vm0, %v997_v4  ;;  %932 = vmatpush3.bf16.msra.mxu0 %v1079_v0  ;;  %v263_v8 = vld [vmem:[%s1341_s2] sm:$0xff]  ;;  %v265_v9 = vld [vmem:[%s1341_s2 + $0x10] sm:$0xff]  ;;  %v897_v10 = vcombine.low %v1107_v7, %v1107_v7  ;;  %v264_v11 = vld [vmem:[%s1341_s2 + $0x8] sm:$0xff] }
   0x4   :  { %933 = vmatprep.subr.bf16.mxu0 %v1084_v1  ;;  %269 = vperm.xlu0 %993, %v263_v8   ;;  %v1000_v12 = vld [vmem:[%s1338_s1 + $0x18] sm:$0xff]   ;;  %v1001_v14 = vld [vmem:[%s1338_s1 + $0x20] sm:$0xff]   ;;  %v541_v17 = vld [vmem:[%s1342_s4 + $0x8] sm:$0xff] }
   0x5   :  { %279 = vperm.xlu1 %994, %v265_v9   ;;  %v266_v13 = vld [vmem:[%s1341_s2 + $0x18] sm:$0xff]  ;;  %v586_v15 = vsel %vm584_vm1, %v897_v10, 0  ;;  %v540_v16 = vld [vmem:[%s1342_s4] sm:$0xff]  ;;  %v542_v18 = vld [vmem:[%s1342_s4 + $0x10] sm:$0xff] }
   0x6   :  { %v1002_v19 = vld [vmem:[%s1338_s1 + $0x28] sm:$0xff]   ;;  %v543_v20 = vld [vmem:[%s1342_s4 + $0x18] sm:$0xff]  ;;  %v1003_v21 = vld [vmem:[%s1338_s1 + $0x30] sm:$0xff]  }
   0x7   :  { %934 = vmatpush3.bf16.msra.mxu0 %v1084_v1  ;;  %v891_v22 = vld [vmem:[%s1341_s2 + $0x20] sm:$0xff]  ;;  %v892_v23 = vld [vmem:[%s1341_s2 + $0x28] sm:$0xff]  ;;  %v893_v24 = vld [vmem:[%s1341_s2 + $0x30] sm:$0xff] }
   0x8   :  { %971 = vmatprep.subr.bf16.mxu0 %v1079_v0  ;;  %274 = vperm.xlu0 %993, %v264_v11   ;;  %v1004_v25 = vld [vmem:[%s1338_s1 + $0x38] sm:$0xff]   ;;  %v709_v26 = vld [vmem:[%s1343_s7 + $0x8] sm:$0xff]  ;;  %v1006_v27 = vld [vmem:[%s1340_s3] sm:$0xff]  }
   0x9   :  { %284 = vperm.xlu1 %994, %v266_v13   ;;  %v710_v28 = vld [vmem:[%s1343_s7 + $0x10] sm:$0xff]  ;;  %v894_v29 = vld [vmem:[%s1341_s2 + $0x38] sm:$0xff]  ;;  %v1007_v31 = vld [vmem:[%s1340_s3 + $0x8] sm:$0xff]  }
   0xa   :  { %936 = vmatmul.mubr.msk.bf16.vlgmr.msra.gmra.mrb[0].mxu0 %vm113_vm0, %v998_v5  ;;  %v711_v30 = vld [vmem:[%s1343_s7 + $0x18] sm:$0xff]  ;;  %v713_v32 = vld [vmem:[%s1343_s7 + $0x28] sm:$0xff]  ;;  %v714_v33 = vld [vmem:[%s1343_s7 + $0x30] sm:$0xff] }
   0xb   :  { %939 = vmatprep.mubr.msk.bf16.mxu0 %vm113_vm0, %v999_v6  ;;  %972 = vmatpush3.bf16.msra.mxu0 %v1079_v0  ;;  %v645_v34 = vld [vmem:[%s1344_s6] sm:$0xff]  ;;  %v646_v35 = vld [vmem:[%s1344_s6 + $0x8] sm:$0xff]  ;;  %v715_v38 = vld [vmem:[%s1343_s7 + $0x38] sm:$0xff] }
   0xc   :  { %973 = vmatprep.subr.bf16.mxu0 %v1084_v1  ;;  %546 = vperm.xlu0 %993, %v540_v16   ;;  %v708_v36 = vld [vmem:[%s1343_s7] sm:$0xff]  ;;  %v717_v40 = vld [vmem:[%s1343_s7 + $0x48] sm:$0xff]  ;;  %v718_v41 = vld [vmem:[%s1343_s7 + $0x50] sm:$0xff] }
   0xd   :  { %551 = vperm.xlu1 %994, %v541_v17   ;;  %v712_v37 = vld [vmem:[%s1343_s7 + $0x20] sm:$0xff] }
   0xe   :  { %v716_v39 = vld [vmem:[%s1343_s7 + $0x40] sm:$0xff] }
   0xf   :  { %974 = vmatpush3.bf16.msra.mxu0 %v1084_v1  ;;  %v731_v42 = vld [vmem:[#allocation2] sm:$0x1] }
  0x10   :  { %989 = vmatprep.subr.msk.bf16.mxu0 %vm584_vm1, %v897_v10  ;;  %556 = vperm.xlu0 %993, %v542_v18   ;;  %v1008_v43 = vld [vmem:[%s1338_s1 + $0x40] sm:$0xff]   ;;  %v1250_v10 = vunpack.c.l.bf16 %v1084_v1 }
  0x11   :  { %561 = vperm.xlu1 %994, %v543_v20   ;;  %955 = vmatprep.mubr.msk.bf16.mxu1 %vm113_vm0, %v1008_v43 }
  0x12   :  { %940 = vmatmul.mubr.msk.bf16.gmra.mrb[4].mxu0 %vm113_vm0, %v1000_v12 }
  0x13   :  { %943 = vmatprep.mubr.msk.bf16.mxu0 %vm113_vm0, %v1001_v14  ;;  %976 = vmatpush3.bf16.msra.mxu0 %v586_v15 }
  0x14   :  { %510 = vperm.xlu0 %993, %v891_v22  }
  0x15   :  { %515 = vperm.xlu1 %994, %v892_v23  }
  0x18   :  { %520 = vperm.xlu0 %993, %v893_v24  }
  0x19   :  { %744 = vperm.xlu1 %994, %v709_v26  }
  0x1a   :  { %944 = vmatmul.mubr.msk.bf16.gmra.mrb[8].mxu0 %vm113_vm0, %v1002_v19 }
  0x1b   :  { %947 = vmatprep.mubr.msk.bf16.mxu0 %vm113_vm0, %v1003_v21 }
  0x1c   :  { %749 = vperm.xlu0 %993, %v710_v28  }
  0x1d   :  { %525 = vperm.xlu1 %994, %v894_v29  }
  0x20   :  { %754 = vperm.xlu0 %993, %v711_v30  }
  0x21   :  { %778 = vperm.xlu1 %994, %v713_v32  }
  0x22   :  { %948 = vmatmul.mubr.msk.bf16.gmra.mrb[12].mxu0 %vm113_vm0, %v1004_v25  ;;  %v1257_v25 = vunpack.c.h.bf16 %v1084_v1 }
  0x23   :  { %977 = vmatprep.mubr.msk.bf16.mxu0 %vm577_vm2, %v1006_v27 }
  0x24   :  { %783 = vperm.xlu0 %993, %v714_v33  }
  0x25   :  { %649 = vperm.xlu1 %994, %v645_v34  }
  0x28   :  { %654 = vperm.xlu0 %993, %v646_v35  }
  0x29   :  { %721 = vperm.xlu1 %994, %v708_v36  }
  0x2a   :  { %978 = vmatmul.mubr.msk.bf16.vlgmr.msra.gmra.mrb[16].mxu0 %vm577_vm2, %v1007_v31 }
  0x2c   :  { %759 = vperm.xlu0 %993, %v712_v37  }
  0x2d   :  { %788 = vperm.xlu1 %994, %v715_v38  }
  0x30   :  { %793 = vperm.xlu0 %993, %v716_v39  }
  0x31   :  { %812 = vperm.xlu1 %994, %v717_v40  }
  0x34   :  { %817 = vperm.xlu0 %993, %v718_v41  }
  0x35   :  { %734 = vperm.xlu1 %994, %v731_v42  }
  0x83   :  { %v1223_v44 = vpop.permute.xlu0 %269 }
  0x84   :  { %v280_v55 = vpop.permute.xlu1 %279 }
  0x87   :  { %v1225_v45 = vpop.permute.xlu0 %274 }
  0x88   :  { %v285_v2 = vpop.permute.xlu1 %284 }
  0x8b   :  { %v1227_v46 = vpop.permute.xlu0 %546 }
  0x8c   :  { %v552_v15 = vpop.permute.xlu1 %551 }
  0x8f   :  { %v1229_v47 = vpop.permute.xlu0 %556 }
  0x90   :  { %v562_v29 = vpop.permute.xlu1 %561 }
  0x93   :  { %v1231_v51 = vpop.permute.xlu0 %510 }
  0x94   :  { %v1265_v40 = vpop.permute.xlu1 %515 }
  0x97   :  { %v1239_v57 = vpop.permute.xlu0 %520 }
  0x9b   :  { %v750_v13 = vpop.permute.xlu0 %749 }
  0x9f   :  { %v755_v26 = vpop.permute.xlu0 %754 }
  0xa3   :  { %v1261_v35 = vpop.permute.xlu0 %783 }
  0xdd   :  { %v937_v48 = vpop.f32.mrb[0].mxu0 }
  0xde   :  { %v172_v49 = vpop.f32.mrb[1].mxu0  ;;  %v237_v58 = vmul.f32 %v937_v48, %v1234_v53 }
  0xdf   :  { %v938_v50 = vpop.f32.mrb[2].mxu0  ;;  %v235_v61 = vmul.f32 %v172_v49, %v1234_v53 }
  0xe0   :  { %v175_v52 = vpop.f32.mrb[3].mxu0  ;;  %v238_v3 = vmul.f32 %v938_v50, %v1234_v53 }
  0xe1   :  { %v236_v6 = vmul.f32 %v175_v52, %v1234_v53 }
  0xe5   :  { %v941_v56 = vpop.f32.mrb[4].mxu0 }
  0xe6   :  { %v241_v59 = vmul.f32 %v941_v56, %v1237_v54  ;;  %v188_v60 = vpop.f32.mrb[5].mxu0 }
  0xe7   :  { %v239_v62 = vmul.f32 %v188_v60, %v1237_v54  ;;  %v942_v63 = vpop.f32.mrb[6].mxu0 }
  0xe8   :  { %v253_v4 = vadd.f32 %v241_v59, %v237_v58  ;;  %v242_v0 = vmul.f32 %v942_v63, %v1237_v54  ;;  %v191_v5 = vpop.f32.mrb[7].mxu0  ;;  %v1269_v58 = vpop.permute.xlu0 %654 }
  0xe9   :  { %v251_v8 = vadd.f32 %v239_v62, %v235_v61  ;;  %v240_v9 = vmul.f32 %v191_v5, %v1237_v54 }
  0xea   :  { %v254_v11 = vadd.f32 %v242_v0, %v238_v3 }
  0xeb   :  { %v252_v12 = vadd.f32 %v240_v9, %v236_v6 }
  0xed   :  { %v945_v14 = vpop.f32.mrb[8].mxu0 }
  0xee   :  { %v245_v16 = vmul.f32 %v945_v14, %v1250_v10  ;;  %v204_v17 = vpop.f32.mrb[9].mxu0 }
  0xef   :  { %v243_v18 = vmul.f32 %v204_v17, %v1250_v10  ;;  %v946_v19 = vpop.f32.mrb[10].mxu0  ;;  %v760_v17 = vpop.permute.xlu0 %759 }
  0xf0   :  { %v257_v20 = vadd.f32 %v253_v4, %v245_v16  ;;  %v246_v21 = vmul.f32 %v946_v19, %v1250_v10  ;;  %v207_v22 = vpop.f32.mrb[11].mxu0  ;;  %v745_v4 = vpop.permute.xlu1 %744 }
  0xf1   :  { %v255_v23 = vadd.f32 %v251_v8, %v243_v18  ;;  %v244_v24 = vmul.f32 %v207_v22, %v1250_v10  ;;  %v1024_v22 = vmov 0.0  }
  0xf2   :  { %v258_v27 = vadd.f32 %v254_v11, %v246_v21 }
  0xf3   :  { %v256_v28 = vadd.f32 %v252_v12, %v244_v24  ;;  %v1012_v24 = vld [vmem:[%s1338_s1 + $0x60] sm:$0xff]  }
  0xf5   :  { %v949_v30 = vpop.f32.mrb[12].mxu0 }
  0xf6   :  { %v249_v31 = vmul.f32 %v949_v30, %v1257_v25  ;;  %v220_v32 = vpop.f32.mrb[13].mxu0 }
  0xf7   :  { %v247_v33 = vmul.f32 %v220_v32, %v1257_v25  ;;  %v950_v34 = vpop.f32.mrb[14].mxu0 }
  0xf8   :  { %v261_v36 = vadd.f32 %v257_v20, %v249_v31  ;;  %v250_v37 = vmul.f32 %v950_v34, %v1257_v25  ;;  %v223_v38 = vpop.f32.mrb[15].mxu0 }
  0xf9   :  { %v259_v39 = vadd.f32 %v255_v23, %v247_v33  ;;  %v248_v1 = vmul.f32 %v223_v38, %v1257_v25  ;;  %v1011_v23 = vld [vmem:[%s1338_s1 + $0x58] sm:$0xff]   ;;  %v526_v33 = vpop.permute.xlu1 %525 }
  0xfa   :  { %v289_v41 = vadd.f32 %v280_v55, %v261_v36  ;;  %v262_v42 = vadd.f32 %v258_v27, %v250_v37  ;;  %v1014_v27 = vld [vmem:[%s1338_s1 + $0x70] sm:$0xff]  }
  0xfb   :  { %v260_v43 = vadd.f32 %v256_v28, %v248_v1  ;;  %v287_v48 = vadd.f32 %v1223_v44, %v259_v39  ;;  %v1015_v28 = vld [vmem:[%s1338_s1 + $0x78] sm:$0xff]  }
  0xfc   :  { %v290_v49 = vadd.f32 %v285_v2, %v262_v42  ;;  %v293_v59 = vmax.f32 %v289_v41, 0.0 }
  0xfd   :  { %v979_v50 = vpop.f32.mrb[16].mxu0  ;;  %v288_v52 = vadd.f32 %v1225_v45, %v260_v43  ;;  %v291_v56 = vmax.f32 %v287_v48, 0.0  ;;  %v1307_v37 = vpop.permute.xlu1 %778 }
  0xfe   :  { %v294_v60 = vmax.f32 %v290_v49, 0.0  ;;  %v631_v61 = vadd.f32 %v979_v50, %v1229_v47  ;;  %v622_v62 = vpop.f32.mrb[17].mxu0  ;;  %v764_v12 = vmul.f32 %v755_v26, %v293_v59  ;;  %v1013_v26 = vld [vmem:[%s1338_s1 + $0x68] sm:$0xff]  }
  0xff   :  { %v623_v63 = vadd.f32 %v622_v62, %v1227_v46  ;;  %v980_v3 = vpop.f32.mrb[18].mxu0  ;;  %v292_v55 = vmax.f32 %v288_v52, 0.0  ;;  %v762_v8 = vmul.f32 %v745_v4, %v291_v56 }
 0x100   :  { %v634_v0 = vadd.f32 %v980_v3, %v562_v29  ;;  %v625_v5 = vpop.f32.mrb[19].mxu0  ;;  %v296_v44 = vpack.c.bf16 %v294_v60, %v293_v59  ;;  %v639_v9 = vmax.f32 %v631_v61, 0.0  ;;  %v765_v46 = vmul.f32 %v760_v17, %v294_v60  ;;  %v1016_v29 = vld [vmem:[%s1345_s5] sm:$0xff]  }
 0x101   :  { %v626_v2 = vadd.f32 %v625_v5, %v552_v15  ;;  %v295_v6 = vpack.c.bf16 %v292_v55, %v291_v56  ;;  %v763_v45 = vmul.f32 %v750_v13, %v292_v55  ;;  %v637_v14 = vmax.f32 %v623_v63, 0.0  ;;  %v1009_v13 = vld [vmem:[%s1338_s1 + $0x48] sm:$0xff]   ;;  %v1010_v15 = vld [vmem:[%s1338_s1 + $0x50] sm:$0xff]   ;;  %v650_v63 = vpop.permute.xlu1 %649 }
 0x102   :  { %v640_v11 = vmax.f32 %v634_v0, 0.0 }
 0x103   :  { %v638_v16 = vmax.f32 %v626_v2, 0.0  ;;  %951 = vmatprep.subr.bf16.mxu1 %v295_v6  ;;  %v766_v47 = vadd.f32 %v763_v45, %v762_v8  ;;  %v44_v8 = vunpack.c.l.bf16 %v1107_v7 }
 0x104   :  { %v644_v18 = vpack.c.bf16 %v640_v11, %v639_v9  ;;  %952 = vmatpush3.bf16.msra.mxu1 %v295_v6 }
 0x105   :  { %v643_v19 = vpack.c.bf16 %v638_v16, %v637_v14  ;;  %v767_v20 = vadd.f32 %v766_v47, %v764_v12  ;;  %953 = vmatprep.subr.bf16.mxu1 %v296_v44 }
 0x107   :  { %v1273_v21 = vadd.f32 %v767_v20, %v765_v46 }
 0x108   :  { %954 = vmatpush3.bf16.msra.mxu1 %v296_v44 }
 0x109   :  { %981 = vmatprep.subr.bf16.mxu1 %v1024_v22 }
 0x10b   :  { %956 = vmatmul.mubr.msk.bf16.vlgmr.msra.gmra.mrb[0].mxu1 %vm113_vm0, %v1009_v13 }
 0x10c   :  { %982 = vmatpush3.bf16.msra.mxu1 %v643_v19  ;;  %959 = vmatprep.mubr.msk.bf16.mxu1 %vm113_vm0, %v1010_v15 }
 0x10d   :  { %983 = vmatprep.subr.bf16.mxu1 %v1024_v22 }
 0x110   :  { %984 = vmatpush3.bf16.msra.mxu1 %v644_v18 }
 0x113   :  { %960 = vmatmul.mubr.msk.bf16.gmra.mrb[4].mxu1 %vm113_vm0, %v1011_v23 }
 0x114   :  { %963 = vmatprep.mubr.msk.bf16.mxu1 %vm113_vm0, %v1012_v24 }
 0x11b   :  { %964 = vmatmul.mubr.msk.bf16.gmra.mrb[8].mxu1 %vm113_vm0, %v1013_v26 }
 0x11c   :  { %967 = vmatprep.mubr.msk.bf16.mxu1 %vm113_vm0, %v1014_v27 }
 0x123   :  { %968 = vmatmul.mubr.msk.bf16.gmra.mrb[12].mxu1 %vm113_vm0, %v1015_v28 }
 0x124   :  { %985 = vmatprep.mubr.msk.bf16.mxu1 %vm1025_vm3, %v1024_v22  ;;  %v769_v22 = vrot.slane %v1273_v21, 4 }
 0x12b   :  { %986 = vmatmul.mubr.msk.bf16.vlgmr.msra.gmra.mrb[16].mxu1 %vm113_vm0, %v1016_v29  ;;  %v794_v29 = vpop.permute.xlu0 %793 }
 0x1de   :  { %v957_v30 = vpop.f32.mrb[0].mxu1 }
 0x1df   :  { %v412_v31 = vpop.f32.mrb[1].mxu1  ;;  %v477_v38 = vmul.f32 %v957_v30, %v1234_v53 }
 0x1e0   :  { %v958_v32 = vpop.f32.mrb[2].mxu1  ;;  %v475_v41 = vmul.f32 %v412_v31, %v1234_v53 }
 0x1e1   :  { %v415_v34 = vpop.f32.mrb[3].mxu1  ;;  %v478_v48 = vmul.f32 %v958_v32, %v1234_v53 }
 0x1e2   :  { %v476_v56 = vmul.f32 %v415_v34, %v1234_v53 }
 0x1e6   :  { %v961_v36 = vpop.f32.mrb[4].mxu1 }
 0x1e7   :  { %v481_v39 = vmul.f32 %v961_v36, %v1237_v54  ;;  %v428_v1 = vpop.f32.mrb[5].mxu1 }
 0x1e8   :  { %v479_v42 = vmul.f32 %v428_v1, %v1237_v54  ;;  %v962_v43 = vpop.f32.mrb[6].mxu1 }
 0x1e9   :  { %v493_v49 = vadd.f32 %v481_v39, %v477_v38  ;;  %v482_v50 = vmul.f32 %v962_v43, %v1237_v54  ;;  %v431_v52 = vpop.f32.mrb[7].mxu1 }
 0x1ea   :  { %v491_v59 = vadd.f32 %v479_v42, %v475_v41  ;;  %v480_v60 = vmul.f32 %v431_v52, %v1237_v54  ;;  %v722_v54 = vpop.permute.xlu1 %721  ;;  %v737_v42 = vlaneseq }
 0x1eb   :  { %v494_v61 = vadd.f32 %v482_v50, %v478_v48  ;;  %v724_v12 = vmul.f32 %v722_v54, %v44_v8 }
 0x1ec   :  { %v492_v62 = vadd.f32 %v480_v60, %v476_v56  ;;  %v818_v56 = vpop.permute.xlu0 %817 }
 0x1ed   :  { %v725_v13 = vrot.slane %v724_v12, 4 }
 0x1ee   :  { %v965_v3 = vpop.f32.mrb[8].mxu1  ;;  %v789_v27 = vpop.permute.xlu1 %788 }
 0x1ef   :  { %v485_v55 = vmul.f32 %v965_v3, %v1250_v10  ;;  %v444_v4 = vpop.f32.mrb[9].mxu1  ;;  %v726_v28 = vadd.f32 %v725_v13, %v724_v12  ;;  %v738_v3 = vshrl.u32 %v737_v42, 7 }
 0x1f0   :  { %v483_v0 = vmul.f32 %v444_v4, %v1250_v10  ;;  %v966_v5 = vpop.f32.mrb[10].mxu1 }
 0x1f1   :  { %v497_v44 = vadd.f32 %v493_v49, %v485_v55  ;;  %v486_v2 = vmul.f32 %v966_v5, %v1250_v10  ;;  %v447_v6 = vpop.f32.mrb[11].mxu1  ;;  %v727_v48 = vrot.slane %v726_v28, 2 }
 0x1f2   :  { %v495_v53 = vadd.f32 %v491_v59, %v483_v0  ;;  %v484_v45 = vmul.f32 %v447_v6, %v1250_v10  ;;  %v813_v52 = vpop.permute.xlu1 %812 }
 0x1f3   :  { %v498_v9 = vadd.f32 %v494_v61, %v486_v2 }
 0x1f4   :  { %v496_v11 = vadd.f32 %v492_v62, %v484_v45 }
 0x1f6   :  { %v969_v14 = vpop.f32.mrb[12].mxu1 }
 0x1f7   :  { %v489_v16 = vmul.f32 %v969_v14, %v1257_v25  ;;  %v460_v47 = vpop.f32.mrb[13].mxu1 }
 0x1f8   :  { %v487_v17 = vmul.f32 %v460_v47, %v1257_v25  ;;  %v970_v18 = vpop.f32.mrb[14].mxu1 }
 0x1f9   :  { %v501_v46 = vadd.f32 %v497_v44, %v489_v16  ;;  %v490_v19 = vmul.f32 %v970_v18, %v1257_v25  ;;  %v463_v20 = vpop.f32.mrb[15].mxu1 }
 0x1fa   :  { %v499_v7 = vadd.f32 %v495_v53, %v487_v17  ;;  %v488_v15 = vmul.f32 %v463_v20, %v1257_v25  ;;  %v770_v25 = vadd.f32 %v769_v22, %v1273_v21 }
 0x1fb   :  { %v502_v10 = vadd.f32 %v498_v9, %v490_v19  ;;  %v530_v23 = vadd.f32 %v1239_v57, %v501_v46 }
 0x1fc   :  { %v528_v24 = vadd.f32 %v1231_v51, %v499_v7  ;;  %v500_v26 = vadd.f32 %v496_v11, %v488_v15  ;;  %v771_v59 = vrot.slane %v770_v25, 2 }
 0x1fd   :  { %v531_v31 = vadd.f32 %v526_v33, %v502_v10  ;;  %v534_v39 = vmax.f32 %v530_v23, 0.0 }
 0x1fe   :  { %v532_v30 = vmax.f32 %v528_v24, 0.0  ;;  %v529_v32 = vadd.f32 %v1265_v40, %v500_v26  ;;  %v699_v34 = vpop.f32.mrb[16].mxu1  ;;  %v772_v0 = vadd.f32 %v771_v59, %v770_v25 }
 0x1ff   :  { %v700_v36 = vadd.f32 %v699_v34, %v650_v63  ;;  %v987_v38 = vpop.f32.mrb[17].mxu1  ;;  %v535_v50 = vmax.f32 %v531_v31, 0.0  ;;  %v798_v60 = vmul.f32 %v789_v27, %v534_v39  ;;  %v728_v63 = vadd.f32 %v727_v48, %v726_v28 }
 0x200   :  { %v533_v1 = vmax.f32 %v529_v32, 0.0  ;;  %v702_v41 = vpop.f32.mrb[18].mxu1  ;;  %v796_v49 = vmul.f32 %v1307_v37, %v532_v30  ;;  %v739_v37 = vsub.s32 0, %v738_v3  ;;  %v773_v53 = vrot.slane %v772_v0, 1 }
 0x201   :  { %v706_v57 = vmax.f32 %v700_v36, 0.0  ;;  %v703_v51 = vadd.f32 %v702_v41, %v1269_v58  ;;  %v988_v43 = vpop.f32.mrb[19].mxu1  ;;  %v799_v55 = vmul.f32 %v794_v29, %v535_v50  ;;  %v729_v2 = vrot.slane %v728_v63, 1 }
 0x202   :  { %v797_v33 = vmul.f32 %v1261_v35, %v533_v1  ;;  %v735_v35 = vpop.permute.xlu1 %734  ;;  %v774_v16 = vadd.f32 %v773_v53, %v772_v0 }
 0x203   :  { %v707_v40 = vmax.f32 %v703_v51, 0.0  ;;  %v820_v61 = vmul.f32 %v813_v52, %v706_v57  ;;  %v730_v9 = vadd.f32 %v729_v2, %v728_v63  ;;  %v740_v11 = vrot.slane %v735_v35, %v739_v37 }
 0x204   :  { %v800_v21 = vadd.f32 %v797_v33, %v796_v49 }
 0x205   :  { %v821_v62 = vmul.f32 %v818_v56, %v707_v40  ;;  %v741_v17 = vadd.f32 %v740_v11, %v730_v9 }
 0x206   :  { %v801_v4 = vadd.f32 %v800_v21, %v798_v60 }
 0x207   :  { %v822_v58 = vadd.f32 %v821_v62, %v820_v61  ;;  %v775_v19 = vadd.f32 %v774_v16, %v741_v17 }
 0x208   :  { %v802_v5 = vadd.f32 %v801_v4, %v799_v55 }
 0x209   :  { %v823_v44 = vrot.slane %v822_v58, 4 }
 0x20a   :  { %v803_v6 = vrot.slane %v802_v5, 4 }
 0x20b   :  { %v824_v8 = vadd.f32 %v823_v44, %v822_v58 }
 0x20c   :  { %v804_v45 = vadd.f32 %v803_v6, %v802_v5 }
 0x20d   :  { %v825_v54 = vrot.slane %v824_v8, 2 }
 0x20e   :  { %v805_v12 = vrot.slane %v804_v45, 2 }
 0x20f   :  { %v826_v14 = vadd.f32 %v825_v54, %v824_v8 }
 0x210   :  { %v806_v47 = vadd.f32 %v805_v12, %v804_v45 }
 0x211   :  { %v827_v46 = vrot.slane %v826_v14, 1 }
 0x212   :  { %v807_v18 = vrot.slane %v806_v47, 1 }
 0x213   :  { %v828_v7 = vadd.f32 %v827_v46, %v826_v14 }
 0x214   :  { %v808_v20 = vadd.f32 %v807_v18, %v806_v47 }
 0x216   :  { %v809_v13 = vadd.f32 %v808_v20, %v775_v19 }
 0x218   :  { %v829_v15 = vadd.f32 %v828_v7, %v809_v13 }
 0x21a   :  { %v902_v10 = vmul.f32 -1.442695, %v829_v15 }
 0x21c   :  { %1019 = vpow2.f32 %v902_v10 }
 0x226   :  { %v1020_v22 = vpop.eup %1019 }
 0x227   :  { %v833_v23 = vadd.f32 1.0, %v1020_v22 }
 0x229   :  { %1021 = vrcp.f32 %v833_v23 }
 0x233   :  { %v1022_v24 = vpop.eup %1021 }
 0x234   :  { %836 = vst [vmem:[%s1346_s9] sm:$0x1] %v1022_v24 }

</bundles_post_ra>
